<compile_context>
chip_gen: v6e
topology: v6e:2x2x1
jax: 0.10.0
libtpu: 0.0.40
codegen_flags: <defaults>
</compile_context>

<pallas_src>
import jax
import jax.numpy as jnp
import numpy as np
from jax.experimental import pallas as pl
from jax.experimental.pallas import tpu as pltpu


def _round_up(x, m):
    return ((x + m - 1) // m) * m


def _nll_kernel(cls_ref,                          # scalar-prefetch: (nt*nt,) int32 tile classes
                y_col_ref, lhs_ref,               # i-tile (reduction) inputs
                y_row_ref, risk_j_ref, e_j_ref,   # j-tile (output) inputs
                term_ref,                         # (1, TILE) output
                acc_ref):                         # (8, TILE) f32 accumulator scratch
    j = pl.program_id(0)
    i = pl.program_id(1)
    nt_i = pl.num_programs(1)

    @pl.when(i == 0)
    def _init():
        acc_ref[...] = jnp.zeros_like(acc_ref)

    cls = cls_ref[j * nt_i + i]   # 0: all-zero mask (skip), 1: all-ones mask, 2: mixed

    @pl.when(cls == 1)
    def _all_ones_tile():
        # Every real row of this i-tile is in the risk set of every column of this
        # j-tile: both reductions collapse to lane sums of the LHS rows (XLU);
        # no TILExTILE compare and no MXU pass.  Padded LHS columns are 0.
        acc_ref[0:1, :] += jnp.sum(lhs_ref[0:1, :], axis=1, keepdims=True)
        acc_ref[1:2, :] += jnp.sum(lhs_ref[1:2, :], axis=1, keepdims=True)

    @pl.when(cls == 2)
    def _mixed_tile():
        # Risk-set mask tile: mask[a, b] = 1 where y_i[a] >= y_j[b].
        mask = (y_col_ref[...] >= y_row_ref[...]).astype(jnp.float32)
        # One MXU matmul yields both partial reductions over this i-tile:
        #   row 0 = sum_i exp(risk_i) * mask[i, j]   (numerator)
        #   row 1 = sum_i 1_real(i)   * mask[i, j]   (denominator)
        acc_ref[...] += jnp.dot(lhs_ref[...], mask,
                                preferred_element_type=jnp.float32)

    @pl.when(i == nt_i - 1)
    def _finalize():
        # log(num/den) as log(num) - log(den): two EUP logs, no f32 divide.
        log_loss = jnp.log(acc_ref[0:1, :]) - jnp.log(acc_ref[1:2, :])
        term_ref[...] = (risk_j_ref[...] - log_loss) * e_j_ref[...]


def negative_log_likelihood(risk_pred, y, e, weights, l2_reg, *, max_tile=1024):
    """risk_pred, y, e: (N, 1) float arrays.  weights: list of 2-D weight matrices."""
    n = risk_pred.shape[0]
    tile = min(max_tile, _round_up(n, 128))
    n_pad = _round_up(n, tile)
    pad = n_pad - n
    num_tiles = n_pad // tile

    risk = risk_pred.astype(jnp.float32).reshape(n)
    y_f = y.astype(jnp.float32).reshape(n)
    e_f = e.astype(jnp.float32).reshape(n)

    # Sort by descending survival time so off-diagonal tile pairs fast-path.
    # The loss is a permutation-invariant sum over j, so this is exact.
    order = jnp.argsort(-y_f)
    y_s = y_f[order]
    risk_s = risk[order]
    e_s = e_f[order]

    # Exact stabilization: the shift cancels in risk_j - log(num_j) + log(den_j).
    risk_shift = risk_s - jnp.max(risk_s)
    exp_row = jnp.exp(risk_shift)

    # Padding: padded y = -1e30 (never enters a real risk set and sorts last),
    # padded exp/ones = 0 (never contributes to either reduction), padded e = 0
    # (padded output columns never contribute to the final sum).
    y_row = jnp.pad(y_s.reshape(1, n), ((0, 0), (0, pad)), constant_values=-1e30)
    risk_row = jnp.pad(risk_shift.reshape(1, n), ((0, 0), (0, pad)))
    e_row = jnp.pad(e_s.reshape(1, n), ((0, 0), (0, pad)))
    exp_row_p = jnp.pad(exp_row.reshape(1, n), ((0, 0), (0, pad)))
    ones_row_p = jnp.pad(jnp.ones((1, n), jnp.float32), ((0, 0), (0, pad)))
    y_col = y_row.reshape(n_pad, 1)

    # MXU LHS precomputed once: row 0 = exp(risk), row 1 = validity, rows 2-7 = 0.
    lhs = jnp.concatenate([exp_row_p, ones_row_p, jnp.zeros((6, n_pad), jnp.float32)],
                          axis=0)

    # Per-tile y extrema -> (j, i) tile classification (0 skip / 1 all-ones / 2 mixed).
    y_tiles = y_row.reshape(num_tiles, tile)
    tmin = jnp.min(y_tiles, axis=1)
    tmax = jnp.max(y_tiles, axis=1)
    all_ones = tmin[None, :] >= tmax[:, None]   # [j, i]: every y_i >= every y_j
    all_zero = tmax[None, :] < tmin[:, None]    # [j, i]: every y_i <  every y_j
    tile_class = jnp.where(all_ones, 1, jnp.where(all_zero, 0, 2)).astype(jnp.int32)
    tile_class = tile_class.reshape(-1)         # flat (nt*nt,) -> cheap SMEM footprint

    i_spec_col = pl.BlockSpec((tile, 1), lambda j, i, cls: (i, 0))
    i_spec_lhs = pl.BlockSpec((8, tile), lambda j, i, cls: (0, i))
    j_spec_row = pl.BlockSpec((1, tile), lambda j, i, cls: (0, j))

    term = pl.pallas_call(
        _nll_kernel,
        out_shape=jax.ShapeDtypeStruct((1, n_pad), jnp.float32),
        grid_spec=pltpu.PrefetchScalarGridSpec(
            num_scalar_prefetch=1,
            grid=(num_tiles, num_tiles),          # (j parallel, i reduction last)
            in_specs=[i_spec_col,                 # y, column-oriented (i-tile)
                      i_spec_lhs,                 # precomputed MXU LHS (i-tile)
                      j_spec_row,                 # y (j-tile)
                      j_spec_row,                 # shifted risk (j-tile)
                      j_spec_row],                # e (j-tile)
            out_specs=j_spec_row,                 # lane-dense (1, TILE) output
            scratch_shapes=[pltpu.VMEM((8, tile), jnp.float32)]),
        compiler_params=pltpu.CompilerParams(
            dimension_semantics=("parallel", "arbitrary")),
    )(tile_class, y_col, lhs, y_row, risk_row, e_row)

    # TODO(synk): division by sum(e) is NaN when there are no events — matches the
    # PyTorch reference, so no guard is added.
    e_sum = jnp.sum(e_f)
    neg_log_loss = -jnp.sum(term) / e_sum

    # L2 (order-2 / Frobenius) regularization over weight matrices, hoisted to JAX.
    l2 = sum(jnp.sqrt(jnp.sum(jnp.square(w.astype(jnp.float32)))) for w in weights)
    return neg_log_loss + jnp.float32(l2_reg) * l2


def _reference(risk_pred, y, e, weights, l2_reg):
    mask = jnp.where((y.T - y) > 0, 0.0, 1.0)
    log_loss = jnp.exp(risk_pred) * mask
    log_loss = jnp.sum(log_loss, axis=0) / jnp.sum(mask, axis=0)
    log_loss = jnp.log(log_loss).reshape(-1, 1)
    nll = -jnp.sum((risk_pred - log_loss) * e) / jnp.sum(e)
    l2 = sum(jnp.linalg.norm(w) for w in weights)
    return nll + l2_reg * l2


if __name__ == "__main__":
    key = jax.random.PRNGKey(0)
    k1, k2, k3, k4, k5, k6 = jax.random.split(key, 6)

    # Small DeepSurv-style setup: batch of 8 survival samples; synthetic model
    # Linear(16, 32) -> Linear(32, 1) supplies the weight matrices for L2 reg.
    N, IN_DIM, HIDDEN, L2_REG = 8, 16, 32, 0.05
    risk_pred = jax.random.normal(k1, (N, 1), dtype=jnp.float32)
    y = jax.random.uniform(k2, (N, 1), dtype=jnp.float32) * 10.0      # survival times
    e = jnp.array([[1.0], [0.0], [1.0], [1.0], [0.0], [1.0], [0.0], [1.0]],
                  dtype=jnp.float32)                                   # event indicators
    w1 = jax.random.normal(k3, (HIDDEN, IN_DIM), dtype=jnp.float32) * 0.1
    w2 = jax.random.normal(k4, (1, HIDDEN), dtype=jnp.float32) * 0.1

    out = jax.block_until_ready(
        negative_log_likelihood(risk_pred, y, e, [w1, w2], L2_REG))
    ref = _reference(risk_pred, y, e, [w1, w2], L2_REG)
    assert np.allclose(np.asarray(out), np.asarray(ref), rtol=1e-5, atol=1e-5), (
        f"pallas={out} ref={ref}")

    # Second check with a forced multi-tile grid (tiny tile) so the all-ones /
    # all-zero / mixed fast paths are all exercised.
    N2 = 300
    risk2 = jax.random.normal(k5, (N2, 1), dtype=jnp.float32)
    y2 = jax.random.uniform(k6, (N2, 1), dtype=jnp.float32) * 10.0
    e2 = (jax.random.uniform(jax.random.PRNGKey(7), (N2, 1)) > 0.3).astype(jnp.float32)
    out2 = jax.block_until_ready(
        negative_log_likelihood(risk2, y2, e2, [w1, w2], L2_REG, max_tile=128))
    ref2 = _reference(risk2, y2, e2, [w1, w2], L2_REG)
    assert np.allclose(np.asarray(out2), np.asarray(ref2), rtol=1e-5, atol=1e-5), (
        f"pallas={out2} ref={ref2}")

    print("KERNEL_OK")
</pallas_src>

<mosaic_0001>
module attributes {stable_mosaic.version = 11 : i64} {
  func.func @_nll_kernel(%arg0: i32, %arg1: i32, %arg2: memref<1xi32, #tpu.memory_space<smem>>, %arg3: memref<128x1xf32, #tpu.memory_space<vmem>>, %arg4: memref<8x128xf32, #tpu.memory_space<vmem>>, %arg5: memref<1x128xf32, #tpu.memory_space<vmem>>, %arg6: memref<1x128xf32, #tpu.memory_space<vmem>>, %arg7: memref<1x128xf32, #tpu.memory_space<vmem>>, %arg8: memref<1x128xf32, #tpu.memory_space<vmem>>, %arg9: memref<8x128xf32, #tpu.memory_space<vmem>>) attributes {dimension_semantics = [#tpu.dimension_semantics<parallel>, #tpu.dimension_semantics<arbitrary>], iteration_bounds = array<i64: 1, 1>, scalar_prefetch = 1 : i64, scratch_operands = 1 : i64, tpu.core_type = #tpu.core_type<tc>, window_params = [{transform_indices = @transform_0, window_bounds = array<i64: 128, 1>}, {transform_indices = @transform_1, window_bounds = array<i64: 8, 128>}, {transform_indices = @transform_2, window_bounds = array<i64: 1, 128>}, {transform_indices = @transform_3, window_bounds = array<i64: 1, 128>}, {transform_indices = @transform_4, window_bounds = array<i64: 1, 128>}, {transform_indices = @transform_5, window_bounds = array<i64: 1, 128>}]} {
    %c0_i32 = arith.constant 0 : i32
    %0 = arith.cmpi eq, %arg1, %c0_i32 : i32
    %1 = arith.extui %0 : i1 to i32
    %c0_i32_0 = arith.constant 0 : i32
    %2 = arith.cmpi ne, %1, %c0_i32_0 : i32
    scf.if %2 {
      %cst = arith.constant 0.000000e+00 : f32
      %16 = vector.broadcast %cst : f32 to vector<8x128xf32>
      %c0 = arith.constant 0 : index
      %c0_6 = arith.constant 0 : index
      %17 = vector.load %arg9[%c0, %c0_6] : memref<8x128xf32, #tpu.memory_space<vmem>>, vector<8x128xf32>
      tpu.vector_store %arg9[%c0, %c0_6], %16 {strides = array<i32>} : memref<8x128xf32, #tpu.memory_space<vmem>>, vector<8x128xf32>,
    } else {
    }
    %c1_i32 = arith.constant 1 : i32
    %3 = arith.muli %arg0, %c1_i32 : i32
    %4 = arith.addi %3, %arg1 : i32
    %5 = arith.index_cast %4 : i32 to index
    %6 = memref.load %arg2[%5] : memref<1xi32, #tpu.memory_space<smem>>
    %c1_i32_1 = arith.constant 1 : i32
    %7 = arith.cmpi eq, %6, %c1_i32_1 : i32
    %8 = arith.extui %7 : i1 to i32
    %c0_i32_2 = arith.constant 0 : i32
    %9 = arith.cmpi ne, %8, %c0_i32_2 : i32
    scf.if %9 {
      %c0 = arith.constant 0 : index
      %c0_6 = arith.constant 0 : index
      %16 = vector.load %arg9[%c0, %c0_6] : memref<8x128xf32, #tpu.memory_space<vmem>>, vector<1x128xf32>
      %c0_7 = arith.constant 0 : index
      %c0_8 = arith.constant 0 : index
      %17 = vector.load %arg4[%c0_7, %c0_8] : memref<8x128xf32, #tpu.memory_space<vmem>>, vector<1x128xf32>
      %cst = arith.constant dense<0.000000e+00> : vector<1xf32>
      %18 = vector.multi_reduction <add>, %17, %cst [1] : vector<1x128xf32> to vector<1xf32>
      %19 = vector.shape_cast %18 : vector<1xf32> to vector<1x1xf32>
      %20 = vector.broadcast %19 : vector<1x1xf32> to vector<1x128xf32>
      %21 = arith.addf %16, %20 : vector<1x128xf32>
      %c0_9 = arith.constant 0 : index
      %c0_10 = arith.constant 0 : index
      %22 = vector.load %arg9[%c0_9, %c0_10] : memref<8x128xf32, #tpu.memory_space<vmem>>, vector<1x128xf32>
      tpu.vector_store %arg9[%c0_9, %c0_10], %21 {strides = array<i32>} : memref<8x128xf32, #tpu.memory_space<vmem>>, vector<1x128xf32>,
      %c1 = arith.constant 1 : index
      %c0_11 = arith.constant 0 : index
      %23 = vector.load %arg9[%c1, %c0_11] : memref<8x128xf32, #tpu.memory_space<vmem>>, vector<1x128xf32>
      %c1_12 = arith.constant 1 : index
      %c0_13 = arith.constant 0 : index
      %24 = vector.load %arg4[%c1_12, %c0_13] : memref<8x128xf32, #tpu.memory_space<vmem>>, vector<1x128xf32>
      %cst_14 = arith.constant dense<0.000000e+00> : vector<1xf32>
      %25 = vector.multi_reduction <add>, %24, %cst_14 [1] : vector<1x128xf32> to vector<1xf32>
      %26 = vector.shape_cast %25 : vector<1xf32> to vector<1x1xf32>
      %27 = vector.broadcast %26 : vector<1x1xf32> to vector<1x128xf32>
      %28 = arith.addf %23, %27 : vector<1x128xf32>
      %c1_15 = arith.constant 1 : index
      %c0_16 = arith.constant 0 : index
      %29 = vector.load %arg9[%c1_15, %c0_16] : memref<8x128xf32, #tpu.memory_space<vmem>>, vector<1x128xf32>
      tpu.vector_store %arg9[%c1_15, %c0_16], %28 {strides = array<i32>} : memref<8x128xf32, #tpu.memory_space<vmem>>, vector<1x128xf32>,
    } else {
    }
    %c2_i32 = arith.constant 2 : i32
    %10 = arith.cmpi eq, %6, %c2_i32 : i32
    %11 = arith.extui %10 : i1 to i32
    %c0_i32_3 = arith.constant 0 : i32
    %12 = arith.cmpi ne, %11, %c0_i32_3 : i32
    scf.if %12 {
      %c0 = arith.constant 0 : index
      %c0_6 = arith.constant 0 : index
      %16 = vector.load %arg3[%c0, %c0_6] : memref<128x1xf32, #tpu.memory_space<vmem>>, vector<128x1xf32>
      %c0_7 = arith.constant 0 : index
      %c0_8 = arith.constant 0 : index
      %17 = vector.load %arg5[%c0_7, %c0_8] : memref<1x128xf32, #tpu.memory_space<vmem>>, vector<1x128xf32>
      %18 = vector.broadcast %16 : vector<128x1xf32> to vector<128x128xf32>
      %19 = vector.broadcast %17 : vector<1x128xf32> to vector<128x128xf32>
      %20 = arith.cmpf oge, %18, %19 : vector<128x128xf32>
      %21 = arith.extui %20 : vector<128x128xi1> to vector<128x128xi32>
      %22 = arith.sitofp %21 : vector<128x128xi32> to vector<128x128xf32>
      %c0_9 = arith.constant 0 : index
      %c0_10 = arith.constant 0 : index
      %23 = vector.load %arg9[%c0_9, %c0_10] : memref<8x128xf32, #tpu.memory_space<vmem>>, vector<8x128xf32>
      %c0_11 = arith.constant 0 : index
      %c0_12 = arith.constant 0 : index
      %24 = vector.load %arg4[%c0_11, %c0_12] : memref<8x128xf32, #tpu.memory_space<vmem>>, vector<8x128xf32>
      %cst = arith.constant dense<0.000000e+00> : vector<8x128xf32>
      %25 = tpu.matmul %24, %22, %cst {dimension_numbers = #tpu.dot_dimension_numbers<[1], [0], [0], [1], [0, 0, 1, 1], [], []>} : vector<8x128xf32>, vector<128x128xf32>, vector<8x128xf32> -> vector<8x128xf32>
      %26 = arith.addf %23, %25 : vector<8x128xf32>
      %c0_13 = arith.constant 0 : index
      %c0_14 = arith.constant 0 : index
      %27 = vector.load %arg9[%c0_13, %c0_14] : memref<8x128xf32, #tpu.memory_space<vmem>>, vector<8x128xf32>
      tpu.vector_store %arg9[%c0_13, %c0_14], %26 {strides = array<i32>} : memref<8x128xf32, #tpu.memory_space<vmem>>, vector<8x128xf32>,
    } else {
    }
    %c0_i32_4 = arith.constant 0 : i32
    %13 = arith.cmpi eq, %arg1, %c0_i32_4 : i32
    %14 = arith.extui %13 : i1 to i32
    %c0_i32_5 = arith.constant 0 : i32
    %15 = arith.cmpi ne, %14, %c0_i32_5 : i32
    scf.if %15 {
      %c0 = arith.constant 0 : index
      %c0_6 = arith.constant 0 : index
      %16 = vector.load %arg9[%c0, %c0_6] : memref<8x128xf32, #tpu.memory_space<vmem>>, vector<1x128xf32>
      %17 = math.log %16 : vector<1x128xf32>
      %c1 = arith.constant 1 : index
      %c0_7 = arith.constant 0 : index
      %18 = vector.load %arg9[%c1, %c0_7] : memref<8x128xf32, #tpu.memory_space<vmem>>, vector<1x128xf32>
      %19 = math.log %18 : vector<1x128xf32>
      %20 = arith.subf %17, %19 : vector<1x128xf32>
      %c0_8 = arith.constant 0 : index
      %c0_9 = arith.constant 0 : index
      %21 = vector.load %arg6[%c0_8, %c0_9] : memref<1x128xf32, #tpu.memory_space<vmem>>, vector<1x128xf32>
      %22 = arith.subf %21, %20 : vector<1x128xf32>
      %c0_10 = arith.constant 0 : index
      %c0_11 = arith.constant 0 : index
      %23 = vector.load %arg7[%c0_10, %c0_11] : memref<1x128xf32, #tpu.memory_space<vmem>>, vector<1x128xf32>
      %24 = arith.mulf %22, %23 : vector<1x128xf32>
      %c0_12 = arith.constant 0 : index
      %c0_13 = arith.constant 0 : index
      %25 = vector.load %arg8[%c0_12, %c0_13] : memref<1x128xf32, #tpu.memory_space<vmem>>, vector<1x128xf32>
      tpu.vector_store %arg8[%c0_12, %c0_13], %24 {strides = array<i32>} : memref<1x128xf32, #tpu.memory_space<vmem>>, vector<1x128xf32>,
    } else {
    }
    return
  }
  func.func @transform_0(%arg0: i32, %arg1: i32, %arg2: memref<1xi32, #tpu.memory_space<smem>>) -> (i32, i32) {
    %c0_i32 = arith.constant 0 : i32
    %c0_i32_0 = arith.constant 0 : i32
    return %arg1, %c0_i32 : i32, i32
  }
  func.func @transform_1(%arg0: i32, %arg1: i32, %arg2: memref<1xi32, #tpu.memory_space<smem>>) -> (i32, i32) {
    %c0_i32 = arith.constant 0 : i32
    %c0_i32_0 = arith.constant 0 : i32
    return %c0_i32, %arg1 : i32, i32
  }
  func.func @transform_2(%arg0: i32, %arg1: i32, %arg2: memref<1xi32, #tpu.memory_space<smem>>) -> (i32, i32) {
    %c0_i32 = arith.constant 0 : i32
    %c0_i32_0 = arith.constant 0 : i32
    return %c0_i32, %arg0 : i32, i32
  }
  func.func @transform_3(%arg0: i32, %arg1: i32, %arg2: memref<1xi32, #tpu.memory_space<smem>>) -> (i32, i32) {
    %c0_i32 = arith.constant 0 : i32
    %c0_i32_0 = arith.constant 0 : i32
    return %c0_i32, %arg0 : i32, i32
  }
  func.func @transform_4(%arg0: i32, %arg1: i32, %arg2: memref<1xi32, #tpu.memory_space<smem>>) -> (i32, i32) {
    %c0_i32 = arith.constant 0 : i32
    %c0_i32_0 = arith.constant 0 : i32
    return %c0_i32, %arg0 : i32, i32
  }
  func.func @transform_5(%arg0: i32, %arg1: i32, %arg2: memref<1xi32, #tpu.memory_space<smem>>) -> (i32, i32) {
    %c0_i32 = arith.constant 0 : i32
    %c0_i32_0 = arith.constant 0 : i32
    return %c0_i32, %arg0 : i32, i32
  }
}

</mosaic_0001>

<bundles_post_ra>
// kernel: tpu_custom_call.1
= control target key start
LH: loop header
LB: loop body
LE: loop exit
PB: predicated region body
PF: predicated region fallthrough
CT: control target
= control target key end

     0   :  { %12 = vsyncpa [#allocation6], 0  ;;  %v428_v0 = vmov 0.0   ;;  %s579_s0 = inlined_call_operand.<no memory space> [shape: s32[1], index: 0, kind: input, shape index: {}]   ;;  %s580_s1 = inlined_call_operand.vmem [shape: f32[128,1], index: 1, kind: input, shape index: {}]   ;;  %s581_s2 = inlined_call_operand.vmem [shape: f32[8,128], index: 2, kind: input, shape index: {}]   ;;  %s582_s3 = inlined_call_operand.vmem [shape: f32[1,128], index: 3, kind: input, shape index: {}]   ;;  %s583_s4 = inlined_call_operand.vmem [shape: f32[1,128], index: 4, kind: input, shape index: {}]   ;;  %s584_s5 = inlined_call_operand.vmem [shape: f32[1,128], index: 5, kind: input, shape index: {}]   ;;  %s585_s6 = inlined_call_operand.hbm [shape: f32[1,128], index: 6, kind: output, shape index: {}]  }
   0x1   :  { %27 = vst [vmem:[#allocation2] sm:$0xff] %v428_v0  ;;  %p307_p0 = scmp.ne.s32.totalorder %s579_s0, 1 }
   0x3   :  { %33 = sbr.rel (%p307_p0) target bundleno = 155 (0x9b), region = 29 }
   0x8   :  { %v35_v1 = vld [vmem:[%s581_s2] sm:$0x1]  ;;  %vm36_vm0 = vcmask 1040384   ;;  %v43_v2 = vld [vmem:[%s581_s2 + $0x1] sm:$0x1] }
   0x9   :  { %v37_v3 = vsel %vm36_vm0, %v35_v1, 0.0  ;;  %v44_v4 = vsel %vm36_vm0, %v43_v2, 0.0  ;;  %v34_v5 = vld [vmem:[#allocation2] sm:$0x1]  ;;  %v42_v8 = vld [vmem:[#allocation2 + $0x1] sm:$0x1] }
   0xa   :  { %38 = vadd.xlane.f32.xlu0 %v37_v3 }
   0xe   :  { %45 = vadd.xlane.f32.xlu0 %v44_v4 }
  0x93   :  { %v39_v6 = vpop.xlane.xlu0 %38 }
  0x94   :  { %v40_v7 = vadd.f32 %v39_v6, %v34_v5 }
  0x96   :  { %41 = vst [vmem:[#allocation2] sm:$0x1] %v40_v7 }
  0x97   :  { %v46_v9 = vpop.xlane.xlu0 %45 }
  0x98   :  { %v47_v10 = vadd.f32 %v46_v9, %v42_v8 }
  0x9a   :  { %48 = vst [vmem:[#allocation2 + $0x1] sm:$0x1] %v47_v10 }
  0x9b PF:  { %p308_p1 = scmp.ne.s32.totalorder %s579_s0, 2 }
  0x9d   :  { %52 = sbr.rel (%p308_p1) target bundleno = 518 (0x206), region = 33 }
  0xa2   :  { %v68_v11 = vld [vmem:[%s580_s1 + $0x78] sm:$0xff]  ;;  %v66_v12 = vld [vmem:[%s580_s1 + $0x68] sm:$0xff]  ;;  %v429_v13 = vmov 0   ;;  %v67_v14 = vld [vmem:[%s580_s1 + $0x70] sm:$0xff]  ;;  %v430_v16 = vmov 0.0   ;;  %vm431_vm1 = vmmov 0  }
  0xa3   :  { %401 = vset.pattern.permute.xlu1 %v429_v13  ;;  %400 = vset.pattern.permute.xlu0 %v429_v13  ;;  %v65_v15 = vld [vmem:[%s580_s1 + $0x60] sm:$0xff]  ;;  %v64_v17 = vld [vmem:[%s580_s1 + $0x58] sm:$0xff]  ;;  %v63_v18 = vld [vmem:[%s580_s1 + $0x50] sm:$0xff]  ;;  %v432_v32 = vmov 1.0  }
  0xa4   :  { %147 = vperm.xlu0 %400, %v68_v11   ;;  %137 = vperm.xlu1 %401, %v66_v12   ;;  %v62_v19 = vld [vmem:[%s580_s1 + $0x48] sm:$0xff]  ;;  %v61_v20 = vld [vmem:[%s580_s1 + $0x40] sm:$0xff]  ;;  %v60_v21 = vld [vmem:[%s580_s1 + $0x38] sm:$0xff] }
  0xa5   :  { %359 = vmatprep.subr.mxu0 %v430_v16  ;;  %v59_v22 = vld [vmem:[%s580_s1 + $0x30] sm:$0xff]  ;;  %v58_v23 = vld [vmem:[%s580_s1 + $0x28] sm:$0xff]  ;;  %v57_v24 = vld [vmem:[%s580_s1 + $0x20] sm:$0xff]  ;;  %391 = vmatprep.mubr.msk.f32.mxu0 %vm431_vm1, %v430_v16 }
  0xa6   :  { %v56_v25 = vld [vmem:[%s580_s1 + $0x18] sm:$0xff]  ;;  %v55_v26 = vld [vmem:[%s580_s1 + $0x10] sm:$0xff]  ;;  %v54_v27 = vld [vmem:[%s580_s1 + $0x8] sm:$0xff] }
  0xa7   :  { %v53_v28 = vld [vmem:[%s580_s1] sm:$0xff] }
  0xa8   :  { %142 = vperm.xlu0 %400, %v67_v14   ;;  %132 = vperm.xlu1 %401, %v65_v15   ;;  %v534_v29 = vld [vmem:[%s582_s3] ss:$0 sm:$0xff] }
  0xa9   :  { %v205_v47 = vld [vmem:[%s581_s2] sm:$0xff] }
  0xaa   :  { %v204_v48 = vld [vmem:[#allocation2] sm:$0xff] }
  0xac   :  { %127 = vperm.xlu0 %400, %v64_v17   ;;  %122 = vperm.xlu1 %401, %v63_v18  }
  0xb0   :  { %117 = vperm.xlu0 %400, %v62_v19   ;;  %112 = vperm.xlu1 %401, %v61_v20  }
  0xb4   :  { %107 = vperm.xlu0 %400, %v60_v21   ;;  %102 = vperm.xlu1 %401, %v59_v22  }
  0xb8   :  { %97 = vperm.xlu0 %400, %v58_v23   ;;  %92 = vperm.xlu1 %401, %v57_v24  }
  0xbc   :  { %87 = vperm.xlu0 %400, %v56_v25   ;;  %82 = vperm.xlu1 %401, %v55_v26  }
  0xc0   :  { %77 = vperm.xlu0 %400, %v54_v27   ;;  %72 = vperm.xlu1 %401, %v53_v28  }
 0x11f   :  { %v148_v30 = vpop.permute.xlu0 %147  ;;  %v138_v31 = vpop.permute.xlu1 %137 }
 0x120   :  { %vm171_vm2 = vcmp.ge.f32.partialorder %v148_v30, %v534_v29  ;;  %vm169_vm4 = vcmp.ge.f32.partialorder %v138_v31, %v534_v29 }
 0x121   :  { %360 = vmatpush3.msk.msra.mxu0 %vm171_vm2, %v432_v32 }
 0x122   :  { %361 = vmatprep.subr.mxu0 %v430_v16 }
 0x123   :  { %v143_v33 = vpop.permute.xlu0 %142  ;;  %v133_v34 = vpop.permute.xlu1 %132 }
 0x124   :  { %vm170_vm3 = vcmp.ge.f32.partialorder %v143_v33, %v534_v29  ;;  %vm168_vm5 = vcmp.ge.f32.partialorder %v133_v34, %v534_v29 }
 0x125   :  { %362 = vmatpush3.msk.msra.mxu0 %vm170_vm3, %v432_v32 }
 0x126   :  { %363 = vmatprep.subr.mxu0 %v430_v16 }
 0x127   :  { %364 = vmatpush3.msk.msra.mxu0 %vm169_vm4, %v432_v32  ;;  %v128_v35 = vpop.permute.xlu0 %127  ;;  %v123_v36 = vpop.permute.xlu1 %122 }
 0x128   :  { %365 = vmatprep.subr.mxu0 %v430_v16  ;;  %vm167_vm6 = vcmp.ge.f32.partialorder %v128_v35, %v534_v29  ;;  %vm166_vm7 = vcmp.ge.f32.partialorder %v123_v36, %v534_v29 }
 0x129   :  { %366 = vmatpush3.msk.msra.mxu0 %vm168_vm5, %v432_v32 }
 0x12a   :  { %367 = vmatprep.subr.mxu0 %v430_v16 }
 0x12b   :  { %368 = vmatpush3.msk.msra.mxu0 %vm167_vm6, %v432_v32  ;;  %v118_v37 = vpop.permute.xlu0 %117  ;;  %v113_v38 = vpop.permute.xlu1 %112 }
 0x12c   :  { %369 = vmatprep.subr.mxu0 %v430_v16  ;;  %vm165_vm8 = vcmp.ge.f32.partialorder %v118_v37, %v534_v29  ;;  %vm164_vm9 = vcmp.ge.f32.partialorder %v113_v38, %v534_v29 }
 0x12d   :  { %370 = vmatpush3.msk.msra.mxu0 %vm166_vm7, %v432_v32 }
 0x12e   :  { %371 = vmatprep.subr.mxu0 %v430_v16 }
 0x12f   :  { %372 = vmatpush3.msk.msra.mxu0 %vm165_vm8, %v432_v32  ;;  %v108_v39 = vpop.permute.xlu0 %107  ;;  %v103_v40 = vpop.permute.xlu1 %102 }
 0x130   :  { %373 = vmatprep.subr.mxu0 %v430_v16  ;;  %vm163_vm10 = vcmp.ge.f32.partialorder %v108_v39, %v534_v29  ;;  %vm162_vm11 = vcmp.ge.f32.partialorder %v103_v40, %v534_v29 }
 0x131   :  { %374 = vmatpush3.msk.msra.mxu0 %vm164_vm9, %v432_v32 }
 0x132   :  { %375 = vmatprep.subr.mxu0 %v430_v16 }
 0x133   :  { %376 = vmatpush3.msk.msra.mxu0 %vm163_vm10, %v432_v32  ;;  %v98_v41 = vpop.permute.xlu0 %97  ;;  %v93_v42 = vpop.permute.xlu1 %92 }
 0x134   :  { %377 = vmatprep.subr.mxu0 %v430_v16  ;;  %vm161_vm12 = vcmp.ge.f32.partialorder %v98_v41, %v534_v29  ;;  %vm160_vm13 = vcmp.ge.f32.partialorder %v93_v42, %v534_v29 }
 0x135   :  { %378 = vmatpush3.msk.msra.mxu0 %vm162_vm11, %v432_v32 }
 0x136   :  { %379 = vmatprep.subr.mxu0 %v430_v16 }
 0x137   :  { %380 = vmatpush3.msk.msra.mxu0 %vm161_vm12, %v432_v32  ;;  %v88_v43 = vpop.permute.xlu0 %87  ;;  %v83_v44 = vpop.permute.xlu1 %82 }
 0x138   :  { %381 = vmatprep.subr.mxu0 %v430_v16  ;;  %vm159_vm14 = vcmp.ge.f32.partialorder %v88_v43, %v534_v29  ;;  %vm158_vm15 = vcmp.ge.f32.partialorder %v83_v44, %v534_v29 }
 0x139   :  { %382 = vmatpush3.msk.msra.mxu0 %vm160_vm13, %v432_v32 }
 0x13a   :  { %383 = vmatprep.subr.mxu0 %v430_v16 }
 0x13b   :  { %384 = vmatpush3.msk.msra.mxu0 %vm159_vm14, %v432_v32  ;;  %v78_v45 = vpop.permute.xlu0 %77  ;;  %v73_v46 = vpop.permute.xlu1 %72 }
 0x13c   :  { %385 = vmatprep.subr.mxu0 %v430_v16  ;;  %vm157_vm0 = vcmp.ge.f32.partialorder %v78_v45, %v534_v29  ;;  %vm156_vm1 = vcmp.ge.f32.partialorder %v73_v46, %v534_v29 }
 0x13d   :  { %386 = vmatpush3.msk.msra.mxu0 %vm158_vm15, %v432_v32 }
 0x13e   :  { %387 = vmatprep.subr.mxu0 %v430_v16 }
 0x13f   :  { %388 = vmatpush3.msk.msra.mxu0 %vm157_vm0, %v432_v32 }
 0x140   :  { %389 = vmatprep.subr.mxu0 %v430_v16 }
 0x141   :  { %390 = vmatpush3.msk.msra.mxu0 %vm156_vm1, %v432_v32 }
 0x142   :  { %392 = vmatmul.mubr.f32.vlgmr.msra.gmra.mxu0 %v205_v47 }
 0x202   :  { %v272_v49 = vpop.f32.mrf.mxu0 }
 0x203   :  { %v276_v50 = vadd.f32 %v272_v49, %v204_v48 }
 0x204   :  { %v393_v51 = vpop.f32.mrf.mxu0 }
 0x205   :  { %277 = vst [vmem:[#allocation2] sm:$0xff] %v276_v50 }
 0x206 PF:  { %v288_v58 = vld [vmem:[%s583_s4] sm:$0x1]  ;;  %s433_s16 = smov [#allocation5]  }
 0x207   :  { %v290_v60 = vld [vmem:[%s584_s5] sm:$0x1]  ;;  %s299_s17 = sshll.u32 %s433_s16, 4  ;;  %s300_s17 = int_to_ptr.vmem [resolvable:$true] %s299_s17 }
 0x208   :  { %s406_s18 = scalar_lea.vmem %s300_s17, 16  ;;  %s410_s19 = scalar_lea.vmem %s300_s17, 32 }
 0x209   :  { %p407_p2 = scmp.ne.s32.totalorder %s300_s17, %s406_s18  ;;  %p411_p3 = scmp.lt.s32.totalorder %s300_s17, %s300_s17 }
 0x20a   :  { %p412_p4 = scmp.lt.s32.totalorder %s410_s19, %s406_s18 }
 0x20c   :  { %v281_v52 = vld [vmem:[#allocation2] sm:$0x1]  ;;  %v284_v53 = vld [vmem:[#allocation2 + $0x1] sm:$0x1]  ;;  %p413_p5 = por %p412_p4, %p411_p3 }
 0x20d   :  { %402 = vlog2.f32 %v281_v52 }
 0x20e   :  { %404 = vlog2.f32 %v284_v53  ;;  %p414_p6 = pnand %p413_p5, %p407_p2 }
 0x21a   :  { %v403_v54 = vpop.eup %402 }
 0x21b   :  { %v405_v55 = vpop.eup %404  ;;  %v283_v56 = vmul.f32 0.6931472, %v403_v54 }
 0x21c   :  { %v286_v57 = vmul.f32 0.6931472, %v405_v55 }
 0x21e   :  { %v287_v59 = vsub.f32 %v283_v56, %v286_v57 }
 0x220   :  { %v289_v61 = vsub.f32 %v288_v58, %v287_v59 }
 0x222   :  { %v291_v62 = vmul.f32 %v290_v60, %v289_v61 }
 0x224   :  { %292 = vst [vmem:[#allocation5] sm:$0x1] %v291_v62 }
 0x225   :  { %417 = shalt.err (!%p414_p6)
}
 0x226   :  { %302 = dma.vmem_to_hbm [thread:$0]  %s300_s17, 16, %s585_s6, [#allocation6]  }
 0x227   :  { %426 = dma.done.wait [#allocation6], 16  }
 0x228   :  { %427 = vsyncadd [#allocation6], 4294967280 }
 0x229   :  { %306 = vsyncpa [#allocation6], 1 }

</bundles_post_ra>
